<compile_context>
chip_gen: v6e
topology: v6e:2x2x1
jax: 0.10.0
libtpu: 0.0.40
codegen_flags: <defaults>
</compile_context>

<pallas_src>
import jax
import jax.numpy as jnp
from jax.experimental import pallas as pl
from jax.experimental.pallas import tpu as pltpu

GOAL_ENCODED_DIM = 25
OBSERVATION_DIM = 26
IN_DIM = GOAL_ENCODED_DIM + OBSERVATION_DIM   # 51
HIDDEN = 96
ACTION_DIM = 2
OBJECT_DIM = 5
TARGET_DIM = 5
HEAD_DIM = ACTION_DIM + OBJECT_DIM + TARGET_DIM   # 12

# Padded (kernel-internal) sizes.
HID_PAD = 128    # 96 -> 128 (full vreg lane width / MXU tile)
HEAD_OUT = 16    # 12 -> 16  (narrow output: 64 B/row of HBM writeback, not 512 B)


def _round_up(n, m):
    return ((n + m - 1) // m) * m


def _toy_task_kernel(x_ref, w1_ref, b1_ref, w2_ref, b2_ref, wh_ref, bh_ref, out_ref):
    # fc1 + ReLU  (K = 51 natural, N padded to 128; zero pads are exact no-ops)
    h1 = jnp.dot(x_ref[...], w1_ref[...], preferred_element_type=jnp.float32) + b1_ref[...]
    h1 = jnp.maximum(h1, 0.0).astype(w2_ref.dtype)

    # fc2 + ReLU
    h2 = jnp.dot(h1, w2_ref[...], preferred_element_type=jnp.float32) + b2_ref[...]
    h2 = jnp.maximum(h2, 0.0).astype(wh_ref.dtype)

    # fused heads (action|object|target): one matmul, one narrow (TM, 16) store
    out_ref[...] = (jnp.dot(h2, wh_ref[...], preferred_element_type=jnp.float32)
                    + bh_ref[...]).astype(out_ref.dtype)


def pack_params(params, compute_dtype=jnp.float32):
    """One-time packing of ToyTaskNet params (call once, reuse across forwards).

    Fuses the three heads into one (HIDDEN, 16) matmul and zero-pads hidden
    dims to 128.  Zero pads contribute exactly 0 to every dot product.
    Weights may be cast to bf16 (f32 accumulation stays); biases stay f32.
    """
    f32 = jnp.float32
    cd = compute_dtype

    w1 = jnp.zeros((IN_DIM, HID_PAD), f32).at[:, :HIDDEN].set(params["w1"]).astype(cd)
    b1 = jnp.zeros((1, HID_PAD), f32).at[:, :HIDDEN].set(params["b1"])
    w2 = jnp.zeros((HID_PAD, HID_PAD), f32).at[:HIDDEN, :HIDDEN].set(params["w2"]).astype(cd)
    b2 = jnp.zeros((1, HID_PAD), f32).at[:, :HIDDEN].set(params["b2"])

    wh = jnp.concatenate([params["wa"], params["wo"], params["wt"]], axis=1)  # (96, 12)
    bh = jnp.concatenate([params["ba"], params["bo"], params["bt"]], axis=1)  # (1, 12)
    wh_p = jnp.zeros((HID_PAD, HEAD_OUT), f32).at[:HIDDEN, :HEAD_DIM].set(wh).astype(cd)
    bh_p = jnp.zeros((1, HEAD_OUT), f32).at[:, :HEAD_DIM].set(bh)

    return dict(w1=w1, b1=b1, w2=w2, b2=b2, wh=wh_p, bh=bh_p)


def _choose_tile(B, tm_max):
    """Batch tile that minimizes pad waste (<8 rows) and gives >=2 grid steps
    (v7x megacore) whenever B is large enough to split."""
    n_tiles = pl.cdiv(B, tm_max)
    if B >= 16:
        n_tiles = max(n_tiles, 2)
    tm = _round_up(pl.cdiv(B, n_tiles), 8)
    return tm, pl.cdiv(B, tm)


def toy_task_net_forward(x, packed, *, tm_max=2048):
    """x: (B, 51).  packed: output of pack_params().
    Returns (action (B,2), objects (B,5), targets (B,5)), float32."""
    B = x.shape[0]
    compute_dtype = packed["w1"].dtype
    x = x.astype(compute_dtype)   # no-op in the default f32 path

    TM, n_steps = _choose_tile(B, tm_max)
    grid = (n_steps,)

    out = pl.pallas_call(
        _toy_task_kernel,
        out_shape=jax.ShapeDtypeStruct((B, HEAD_OUT), jnp.float32),
        grid=grid,
        in_specs=[
            pl.BlockSpec((TM, IN_DIM), lambda i: (i, 0)),         # x: walks batch
            pl.BlockSpec((IN_DIM, HID_PAD), lambda i: (0, 0)),    # w1: VMEM-resident
            pl.BlockSpec((1, HID_PAD), lambda i: (0, 0)),         # b1
            pl.BlockSpec((HID_PAD, HID_PAD), lambda i: (0, 0)),   # w2
            pl.BlockSpec((1, HID_PAD), lambda i: (0, 0)),         # b2
            pl.BlockSpec((HID_PAD, HEAD_OUT), lambda i: (0, 0)),  # fused head W
            pl.BlockSpec((1, HEAD_OUT), lambda i: (0, 0)),        # fused head b
        ],
        out_specs=pl.BlockSpec((TM, HEAD_OUT), lambda i: (i, 0)),
        compiler_params=pltpu.CompilerParams(
            dimension_semantics=("parallel",)),                   # v7x: 2 TCs share batch
    )(x, packed["w1"], packed["b1"], packed["w2"], packed["b2"],
      packed["wh"], packed["bh"])

    action = out[:, 0:ACTION_DIM]
    objects = out[:, ACTION_DIM:ACTION_DIM + OBJECT_DIM]
    targets = out[:, ACTION_DIM + OBJECT_DIM:HEAD_DIM]
    return action, objects, targets


def init_params(key):
    """Deterministic parameter init (shapes match ToyTaskNet.__init__), stored (in, out)."""
    ks = jax.random.split(key, 10)

    def lin(kw, kb, fan_in, fan_out):
        bound = 1.0 / jnp.sqrt(jnp.float32(fan_in))
        w = jax.random.uniform(kw, (fan_in, fan_out), jnp.float32, -bound, bound)
        b = jax.random.uniform(kb, (1, fan_out), jnp.float32, -bound, bound)
        return w, b

    w1, b1 = lin(ks[0], ks[1], IN_DIM, HIDDEN)
    w2, b2 = lin(ks[2], ks[3], HIDDEN, HIDDEN)
    wa, ba = lin(ks[4], ks[5], HIDDEN, ACTION_DIM)
    wo, bo = lin(ks[6], ks[7], HIDDEN, OBJECT_DIM)
    wt, bt = lin(ks[8], ks[9], HIDDEN, TARGET_DIM)
    return dict(w1=w1, b1=b1, w2=w2, b2=b2,
                wa=wa, ba=ba, wo=wo, bo=bo, wt=wt, bt=bt)


def _reference(x, p):
    h1 = jnp.maximum(x @ p["w1"] + p["b1"], 0.0)
    h2 = jnp.maximum(h1 @ p["w2"] + p["b2"], 0.0)
    return h2 @ p["wa"] + p["ba"], h2 @ p["wo"] + p["bo"], h2 @ p["wt"] + p["bt"]


if __name__ == "__main__":
    key = jax.random.PRNGKey(0)
    k_param, k_x = jax.random.split(key)

    params = init_params(k_param)
    packed = pack_params(params)            # one-time pack (hoisted out of forward)

    batch = 8
    x = jax.random.normal(k_x, (batch, IN_DIM), jnp.float32)

    action, objects, targets = toy_task_net_forward(x, packed)
    jax.block_until_ready((action, objects, targets))

    # sanity check vs. pure-JAX reference
    ra, ro, rt = _reference(x, params)
    assert action.shape == (batch, ACTION_DIM)
    assert objects.shape == (batch, OBJECT_DIM)
    assert targets.shape == (batch, TARGET_DIM)
    assert jnp.allclose(action, ra, atol=1e-5, rtol=1e-5)
    assert jnp.allclose(objects, ro, atol=1e-5, rtol=1e-5)
    assert jnp.allclose(targets, rt, atol=1e-5, rtol=1e-5)

    # also exercise a ragged / multi-tile batch (edge-block handling + >=2 grid steps)
    x_big = jax.random.normal(k_x, (37, IN_DIM), jnp.float32)
    a2, o2, t2 = toy_task_net_forward(x_big, packed, tm_max=16)
    ra2, ro2, rt2 = _reference(x_big, params)
    assert jnp.allclose(a2, ra2, atol=1e-5, rtol=1e-5)
    assert jnp.allclose(o2, ro2, atol=1e-5, rtol=1e-5)
    assert jnp.allclose(t2, rt2, atol=1e-5, rtol=1e-5)

    print("KERNEL_OK")
</pallas_src>

<mosaic_0001>
module attributes {stable_mosaic.version = 11 : i64} {
  func.func @_toy_task_kernel(%arg0: i32, %arg1: memref<8x51xf32, #tpu.memory_space<vmem>>, %arg2: memref<51x128xf32, #tpu.memory_space<vmem>>, %arg3: memref<1x128xf32, #tpu.memory_space<vmem>>, %arg4: memref<128x128xf32, #tpu.memory_space<vmem>>, %arg5: memref<1x128xf32, #tpu.memory_space<vmem>>, %arg6: memref<128x16xf32, #tpu.memory_space<vmem>>, %arg7: memref<1x16xf32, #tpu.memory_space<vmem>>, %arg8: memref<8x16xf32, #tpu.memory_space<vmem>>) attributes {dimension_semantics = [#tpu.dimension_semantics<parallel>], iteration_bounds = array<i64: 1>, scalar_prefetch = 0 : i64, scratch_operands = 0 : i64, tpu.core_type = #tpu.core_type<tc>, window_params = [{transform_indices = @transform_0, window_bounds = array<i64: 8, 51>}, {pipeline_mode = #tpu.pipeline_mode<synchronous>, transform_indices = @transform_1, window_bounds = array<i64: 51, 128>}, {pipeline_mode = #tpu.pipeline_mode<synchronous>, transform_indices = @transform_2, window_bounds = array<i64: 1, 128>}, {pipeline_mode = #tpu.pipeline_mode<synchronous>, transform_indices = @transform_3, window_bounds = array<i64: 128, 128>}, {pipeline_mode = #tpu.pipeline_mode<synchronous>, transform_indices = @transform_4, window_bounds = array<i64: 1, 128>}, {pipeline_mode = #tpu.pipeline_mode<synchronous>, transform_indices = @transform_5, window_bounds = array<i64: 128, 16>}, {pipeline_mode = #tpu.pipeline_mode<synchronous>, transform_indices = @transform_6, window_bounds = array<i64: 1, 16>}, {transform_indices = @transform_7, window_bounds = array<i64: 8, 16>}]} {
    %c0 = arith.constant 0 : index
    %c0_0 = arith.constant 0 : index
    %0 = vector.load %arg1[%c0, %c0_0] : memref<8x51xf32, #tpu.memory_space<vmem>>, vector<8x51xf32>
    %c0_1 = arith.constant 0 : index
    %c0_2 = arith.constant 0 : index
    %1 = vector.load %arg2[%c0_1, %c0_2] : memref<51x128xf32, #tpu.memory_space<vmem>>, vector<51x128xf32>
    %cst = arith.constant dense<0.000000e+00> : vector<8x128xf32>
    %2 = tpu.matmul %0, %1, %cst {dimension_numbers = #tpu.dot_dimension_numbers<[1], [0], [0], [1], [0, 0, 1, 1], [], []>} : vector<8x51xf32>, vector<51x128xf32>, vector<8x128xf32> -> vector<8x128xf32>
    %c0_3 = arith.constant 0 : index
    %c0_4 = arith.constant 0 : index
    %3 = vector.load %arg3[%c0_3, %c0_4] : memref<1x128xf32, #tpu.memory_space<vmem>>, vector<1x128xf32>
    %4 = vector.broadcast %3 : vector<1x128xf32> to vector<8x128xf32>
    %5 = arith.addf %2, %4 : vector<8x128xf32>
    %cst_5 = arith.constant 0.000000e+00 : f32
    %6 = vector.broadcast %cst_5 : f32 to vector<8x128xf32>
    %7 = arith.maximumf %5, %6 : vector<8x128xf32>
    %c0_6 = arith.constant 0 : index
    %c0_7 = arith.constant 0 : index
    %8 = vector.load %arg4[%c0_6, %c0_7] : memref<128x128xf32, #tpu.memory_space<vmem>>, vector<128x128xf32>
    %cst_8 = arith.constant dense<0.000000e+00> : vector<8x128xf32>
    %9 = tpu.matmul %7, %8, %cst_8 {dimension_numbers = #tpu.dot_dimension_numbers<[1], [0], [0], [1], [0, 0, 1, 1], [], []>} : vector<8x128xf32>, vector<128x128xf32>, vector<8x128xf32> -> vector<8x128xf32>
    %c0_9 = arith.constant 0 : index
    %c0_10 = arith.constant 0 : index
    %10 = vector.load %arg5[%c0_9, %c0_10] : memref<1x128xf32, #tpu.memory_space<vmem>>, vector<1x128xf32>
    %11 = vector.broadcast %10 : vector<1x128xf32> to vector<8x128xf32>
    %12 = arith.addf %9, %11 : vector<8x128xf32>
    %cst_11 = arith.constant 0.000000e+00 : f32
    %13 = vector.broadcast %cst_11 : f32 to vector<8x128xf32>
    %14 = arith.maximumf %12, %13 : vector<8x128xf32>
    %c0_12 = arith.constant 0 : index
    %c0_13 = arith.constant 0 : index
    %15 = vector.load %arg6[%c0_12, %c0_13] : memref<128x16xf32, #tpu.memory_space<vmem>>, vector<128x16xf32>
    %cst_14 = arith.constant dense<0.000000e+00> : vector<8x16xf32>
    %16 = tpu.matmul %14, %15, %cst_14 {dimension_numbers = #tpu.dot_dimension_numbers<[1], [0], [0], [1], [0, 0, 1, 1], [], []>} : vector<8x128xf32>, vector<128x16xf32>, vector<8x16xf32> -> vector<8x16xf32>
    %c0_15 = arith.constant 0 : index
    %c0_16 = arith.constant 0 : index
    %17 = vector.load %arg7[%c0_15, %c0_16] : memref<1x16xf32, #tpu.memory_space<vmem>>, vector<1x16xf32>
    %18 = vector.broadcast %17 : vector<1x16xf32> to vector<8x16xf32>
    %19 = arith.addf %16, %18 : vector<8x16xf32>
    %c0_17 = arith.constant 0 : index
    %c0_18 = arith.constant 0 : index
    %20 = vector.load %arg8[%c0_17, %c0_18] : memref<8x16xf32, #tpu.memory_space<vmem>>, vector<8x16xf32>
    tpu.vector_store %arg8[%c0_17, %c0_18], %19 {strides = array<i32>} : memref<8x16xf32, #tpu.memory_space<vmem>>, vector<8x16xf32>,
    return
  }
  func.func @transform_0(%arg0: i32) -> (i32, i32) {
    %c0_i32 = arith.constant 0 : i32
    %c0_i32_0 = arith.constant 0 : i32
    return %arg0, %c0_i32 : i32, i32
  }
  func.func @transform_1(%arg0: i32) -> (i32, i32) {
    %c0_i32 = arith.constant 0 : i32
    %c0_i32_0 = arith.constant 0 : i32
    %c0_i32_1 = arith.constant 0 : i32
    return %c0_i32, %c0_i32_0 : i32, i32
  }
  func.func @transform_2(%arg0: i32) -> (i32, i32) {
    %c0_i32 = arith.constant 0 : i32
    %c0_i32_0 = arith.constant 0 : i32
    %c0_i32_1 = arith.constant 0 : i32
    return %c0_i32, %c0_i32_0 : i32, i32
  }
  func.func @transform_3(%arg0: i32) -> (i32, i32) {
    %c0_i32 = arith.constant 0 : i32
    %c0_i32_0 = arith.constant 0 : i32
    %c0_i32_1 = arith.constant 0 : i32
    return %c0_i32, %c0_i32_0 : i32, i32
  }
  func.func @transform_4(%arg0: i32) -> (i32, i32) {
    %c0_i32 = arith.constant 0 : i32
    %c0_i32_0 = arith.constant 0 : i32
    %c0_i32_1 = arith.constant 0 : i32
    return %c0_i32, %c0_i32_0 : i32, i32
  }
  func.func @transform_5(%arg0: i32) -> (i32, i32) {
    %c0_i32 = arith.constant 0 : i32
    %c0_i32_0 = arith.constant 0 : i32
    %c0_i32_1 = arith.constant 0 : i32
    return %c0_i32, %c0_i32_0 : i32, i32
  }
  func.func @transform_6(%arg0: i32) -> (i32, i32) {
    %c0_i32 = arith.constant 0 : i32
    %c0_i32_0 = arith.constant 0 : i32
    %c0_i32_1 = arith.constant 0 : i32
    return %c0_i32, %c0_i32_0 : i32, i32
  }
  func.func @transform_7(%arg0: i32) -> (i32, i32) {
    %c0_i32 = arith.constant 0 : i32
    %c0_i32_0 = arith.constant 0 : i32
    return %arg0, %c0_i32 : i32, i32
  }
}

</mosaic_0001>

<bundles_post_ra>
// kernel: tpu_custom_call.1
= control target key start
LH: loop header
LB: loop body
LE: loop exit
PB: predicated region body
PF: predicated region fallthrough
CT: control target
= control target key end

     0   :  { %12 = vsyncpa [#allocation3], 0  ;;  %s728_s0 = inlined_call_operand.vmem [shape: f32[8,51], index: 0, kind: input, shape index: {}]   ;;  %s729_s1 = inlined_call_operand.hbm [shape: f32[51,128], index: 1, kind: input, shape index: {}]   ;;  %s730_s2 = inlined_call_operand.vmem [shape: f32[1,128], index: 2, kind: input, shape index: {}]   ;;  %s731_s3 = inlined_call_operand.vmem [shape: f32[128,128], index: 3, kind: input, shape index: {}]   ;;  %s732_s4 = inlined_call_operand.vmem [shape: f32[1,128], index: 4, kind: input, shape index: {}]   ;;  %s733_s5 = inlined_call_operand.vmem [shape: f32[128,16], index: 5, kind: input, shape index: {}]   ;;  %s734_s6 = inlined_call_operand.vmem [shape: f32[1,16], index: 6, kind: input, shape index: {}]   ;;  %s735_s7 = inlined_call_operand.hbm [shape: f32[8,16], index: 7, kind: output, shape index: {}]  }
   0x1   :  { %13 = vsyncpa [#allocation4], 0  ;;  %s523_s24 = smov [#allocation2]  }
   0x2   :  { %s21_s25 = sshll.u32 %s523_s24, 4  ;;  %s22_s25 = int_to_ptr.vmem [resolvable:$true] %s21_s25 }
   0x3   :  { %s487_s26 = scalar_lea.vmem %s22_s25, 896  ;;  %p492_p1 = scmp.lt.s32.totalorder %s22_s25, %s22_s25 }
   0x4   :  { %p488_p0 = scmp.ne.s32.totalorder %s22_s25, %s487_s26  ;;  %p493_p2 = scmp.lt.s32.totalorder %s487_s26, %s487_s26 }
   0x6   :  { %p494_p3 = por %p493_p2, %p492_p1 }
   0x8   :  { %p495_p4 = pnand %p494_p3, %p488_p0 }
   0xa   :  { %498 = shalt.err (!%p495_p4)
}
   0xb   :  { %s524_s27 = smov 128   ;;  %s525_s28 = smov 8  }
   0xc   :  { %27 = dma.hbm_to_vmem [thread:$0]  %s729_s1, 896, %s22_s25, [#allocation3], %s524_s27, %s524_s27, %s525_s28  }
   0xd   :  { %519 = dma.done.wait [#allocation3], 896  }
   0xe   :  { %520 = vsyncadd [#allocation3], 4294966400  ;;  %v526_v0 = vmov 0.0   ;;  %vm527_vm0 = vmmov 0   ;;  %vm60_vm1 = vcmask 1042432   ;;  %v47_v2 = vld [vmem:[#allocation2 + $0x28] sm:$0xff] }
   0xf   :  { %386 = vmatprep.subr.mxu0 %v526_v0  ;;  %400 = vmatprep.mubr.msk.f32.mxu0 %vm527_vm0, %v526_v0  ;;  %v48_v1 = vld [vmem:[#allocation2 + $0x30] sm:$0x7]  ;;  %v46_v3 = vld [vmem:[#allocation2 + $0x20] sm:$0xff]  ;;  %v150_v4 = vld [vmem:[%s731_s3 + $0x78] sm:$0xff]  ;;  %vm56_vm2 = vcmask 416768   ;;  %s528_s25 = smov [#allocation5]  }
  0x10   :  { %403 = vmatprep.subr.mxu1 %v526_v0  ;;  %435 = vmatprep.mubr.msk.f32.mxu1 %vm527_vm0, %v526_v0  ;;  %v149_v5 = vld [vmem:[%s731_s3 + $0x70] sm:$0xff]  ;;  %v45_v6 = vld [vmem:[#allocation2 + $0x18] sm:$0xff]  ;;  %v148_v7 = vld [vmem:[%s731_s3 + $0x68] sm:$0xff]  ;;  %s330_s26 = sshll.u32 %s528_s25, 4  ;;  %vm322_vm3 = vcmask 130048   ;;  %s331_s26 = int_to_ptr.vmem [resolvable:$true] %s330_s26 }
  0x11   :  { %387 = vmatpush3.msk.msra.mxu0 %vm60_vm1, %v48_v1  ;;  %404 = vmatpush3.msra.mxu1 %v150_v4  ;;  %v44_v8 = vld [vmem:[#allocation2 + $0x10] sm:$0xff]  ;;  %v147_v9 = vld [vmem:[%s731_s3 + $0x60] sm:$0xff]  ;;  %v43_v10 = vld [vmem:[#allocation2 + $0x8] sm:$0xff]  ;;  %p504_p6 = scmp.lt.s32.totalorder %s331_s26, %s331_s26 }
  0x12   :  { %388 = vmatprep.subr.mxu0 %v526_v0  ;;  %405 = vmatprep.subr.mxu1 %v526_v0  ;;  %v146_v11 = vld [vmem:[%s731_s3 + $0x58] sm:$0xff]  ;;  %v42_v12 = vld [vmem:[#allocation2] sm:$0xff]  ;;  %v145_v13 = vld [vmem:[%s731_s3 + $0x50] sm:$0xff] }
  0x13   :  { %389 = vmatpush3.msra.mxu0 %v47_v2  ;;  %406 = vmatpush3.msra.mxu1 %v149_v5  ;;  %v41_v14 = vld [vmem:[%s728_s0] sm:$0xff]  ;;  %v144_v15 = vld [vmem:[%s731_s3 + $0x48] sm:$0xff]  ;;  %v142_v17 = vld [vmem:[%s731_s3 + $0x38] sm:$0xff] }
  0x14   :  { %390 = vmatprep.subr.mxu0 %v526_v0  ;;  %407 = vmatprep.subr.mxu1 %v526_v0  ;;  %v143_v16 = vld [vmem:[%s731_s3 + $0x40] sm:$0xff]  ;;  %v141_v18 = vld [vmem:[%s731_s3 + $0x30] sm:$0xff]  ;;  %v140_v19 = vld [vmem:[%s731_s3 + $0x28] sm:$0xff] }
  0x15   :  { %391 = vmatpush3.msra.mxu0 %v46_v3  ;;  %408 = vmatpush3.msra.mxu1 %v148_v7  ;;  %v139_v20 = vld [vmem:[%s731_s3 + $0x20] sm:$0xff]  ;;  %v138_v21 = vld [vmem:[%s731_s3 + $0x18] sm:$0xff]  ;;  %v137_v22 = vld [vmem:[%s731_s3 + $0x10] sm:$0xff] }
  0x16   :  { %392 = vmatprep.subr.mxu0 %v526_v0  ;;  %409 = vmatprep.subr.mxu1 %v526_v0  ;;  %v136_v23 = vld [vmem:[%s731_s3 + $0x8] sm:$0xff]  ;;  %v135_v24 = vld [vmem:[%s731_s3] sm:$0xff]  ;;  %v244_v25 = vld [vmem:[%s733_s5 + $0x78] sm:$0xff] }
  0x17   :  { %393 = vmatpush3.msra.mxu0 %v45_v6  ;;  %410 = vmatpush3.msra.mxu1 %v147_v9  ;;  %v243_v26 = vld [vmem:[%s733_s5 + $0x70] sm:$0xff]  ;;  %v242_v27 = vld [vmem:[%s733_s5 + $0x68] sm:$0xff]  ;;  %v241_v28 = vld [vmem:[%s733_s5 + $0x60] sm:$0xff] }
  0x18   :  { %394 = vmatprep.subr.mxu0 %v526_v0  ;;  %411 = vmatprep.subr.mxu1 %v526_v0  ;;  %v240_v29 = vld [vmem:[%s733_s5 + $0x58] sm:$0xff]  ;;  %v239_v30 = vld [vmem:[%s733_s5 + $0x50] sm:$0xff]  ;;  %v238_v31 = vld [vmem:[%s733_s5 + $0x48] sm:$0xff] }
  0x19   :  { %395 = vmatpush3.msra.mxu0 %v44_v8  ;;  %412 = vmatpush3.msra.mxu1 %v146_v11  ;;  %v237_v32 = vld [vmem:[%s733_s5 + $0x40] sm:$0xff]  ;;  %v236_v33 = vld [vmem:[%s733_s5 + $0x38] sm:$0xff]  ;;  %v235_v34 = vld [vmem:[%s733_s5 + $0x30] sm:$0xff] }
  0x1a   :  { %396 = vmatprep.subr.mxu0 %v526_v0  ;;  %413 = vmatprep.subr.mxu1 %v526_v0  ;;  %v234_v35 = vld [vmem:[%s733_s5 + $0x28] sm:$0xff]  ;;  %v233_v36 = vld [vmem:[%s733_s5 + $0x20] sm:$0xff]  ;;  %v232_v37 = vld [vmem:[%s733_s5 + $0x18] sm:$0xff] }
  0x1b   :  { %397 = vmatpush3.msra.mxu0 %v43_v10  ;;  %414 = vmatpush3.msra.mxu1 %v145_v13  ;;  %v339_v38 = vld [vmem:[%s730_s2] ss:$0 sm:$0xff]  ;;  %v231_v43 = vld [vmem:[%s733_s5 + $0x10] sm:$0xff]  ;;  %v230_v44 = vld [vmem:[%s733_s5 + $0x8] sm:$0xff] }
  0x1c   :  { %398 = vmatprep.subr.mxu0 %v526_v0  ;;  %415 = vmatprep.subr.mxu1 %v526_v0  ;;  %v229_v45 = vld [vmem:[%s733_s5] sm:$0xff]  ;;  %s499_s5 = scalar_lea.vmem %s331_s26, 128 }
  0x1d   :  { %399 = vmatpush3.msra.mxu0 %v42_v12  ;;  %416 = vmatpush3.msra.mxu1 %v144_v15  ;;  %v342_v46 = vld [vmem:[%s732_s4] ss:$0 sm:$0xff]  ;;  %p500_p5 = scmp.ne.s32.totalorder %s331_s26, %s499_s5  ;;  %p505_p7 = scmp.lt.s32.totalorder %s499_s5, %s499_s5 }
  0x1e   :  { %401 = vmatmul.mubr.msk.f32.vlgmr.msra.gmra.mxu0 %vm56_vm2, %v41_v14  ;;  %438 = vmatprep.subr.mxu0 %v526_v0  ;;  %v343_v51 = vld [vmem:[%s734_s6] ss:$0 sm:$0xff] }
  0x1f   :  { %417 = vmatprep.subr.mxu1 %v526_v0  ;;  %470 = vmatprep.mubr.msk.f32.mxu0 %vm527_vm0, %v526_v0  ;;  %p506_p8 = por %p505_p7, %p504_p6 }
  0x20   :  { %418 = vmatpush3.msra.mxu1 %v143_v16  ;;  %439 = vmatpush3.msra.mxu0 %v244_v25 }
  0x21   :  { %419 = vmatprep.subr.mxu1 %v526_v0  ;;  %440 = vmatprep.subr.mxu0 %v526_v0  ;;  %p507_p9 = pnand %p506_p8, %p500_p5 }
  0x22   :  { %420 = vmatpush3.msra.mxu1 %v142_v17  ;;  %441 = vmatpush3.msra.mxu0 %v243_v26 }
  0x23   :  { %421 = vmatprep.subr.mxu1 %v526_v0  ;;  %442 = vmatprep.subr.mxu0 %v526_v0 }
  0x24   :  { %422 = vmatpush3.msra.mxu1 %v141_v18  ;;  %443 = vmatpush3.msra.mxu0 %v242_v27 }
  0x25   :  { %423 = vmatprep.subr.mxu1 %v526_v0  ;;  %444 = vmatprep.subr.mxu0 %v526_v0 }
  0x26   :  { %424 = vmatpush3.msra.mxu1 %v140_v19  ;;  %445 = vmatpush3.msra.mxu0 %v241_v28 }
  0x27   :  { %425 = vmatprep.subr.mxu1 %v526_v0  ;;  %446 = vmatprep.subr.mxu0 %v526_v0 }
  0x28   :  { %426 = vmatpush3.msra.mxu1 %v139_v20  ;;  %447 = vmatpush3.msra.mxu0 %v240_v29 }
  0x29   :  { %427 = vmatprep.subr.mxu1 %v526_v0  ;;  %448 = vmatprep.subr.mxu0 %v526_v0 }
  0x2a   :  { %428 = vmatpush3.msra.mxu1 %v138_v21  ;;  %449 = vmatpush3.msra.mxu0 %v239_v30 }
  0x2b   :  { %429 = vmatprep.subr.mxu1 %v526_v0  ;;  %450 = vmatprep.subr.mxu0 %v526_v0 }
  0x2c   :  { %430 = vmatpush3.msra.mxu1 %v137_v22  ;;  %451 = vmatpush3.msra.mxu0 %v238_v31 }
  0x2d   :  { %431 = vmatprep.subr.mxu1 %v526_v0  ;;  %452 = vmatprep.subr.mxu0 %v526_v0 }
  0x2e   :  { %432 = vmatpush3.msra.mxu1 %v136_v23  ;;  %453 = vmatpush3.msra.mxu0 %v237_v32 }
  0x2f   :  { %433 = vmatprep.subr.mxu1 %v526_v0  ;;  %454 = vmatprep.subr.mxu0 %v526_v0 }
  0x30   :  { %434 = vmatpush3.msra.mxu1 %v135_v24  ;;  %455 = vmatpush3.msra.mxu0 %v236_v33 }
  0x31   :  { %456 = vmatprep.subr.mxu0 %v526_v0 }
  0x32   :  { %457 = vmatpush3.msra.mxu0 %v235_v34 }
  0x33   :  { %458 = vmatprep.subr.mxu0 %v526_v0 }
  0x34   :  { %459 = vmatpush3.msra.mxu0 %v234_v35 }
  0x35   :  { %460 = vmatprep.subr.mxu0 %v526_v0 }
  0x36   :  { %461 = vmatpush3.msra.mxu0 %v233_v36 }
  0x37   :  { %462 = vmatprep.subr.mxu0 %v526_v0 }
  0x38   :  { %463 = vmatpush3.msra.mxu0 %v232_v37 }
  0x39   :  { %464 = vmatprep.subr.mxu0 %v526_v0 }
  0x3a   :  { %465 = vmatpush3.msra.mxu0 %v231_v43 }
  0x3b   :  { %466 = vmatprep.subr.mxu0 %v526_v0 }
  0x3c   :  { %467 = vmatpush3.msra.mxu0 %v230_v44 }
  0x3d   :  { %468 = vmatprep.subr.mxu0 %v526_v0 }
  0x3e   :  { %469 = vmatpush3.msra.mxu0 %v229_v45 }
  0xde   :  { %v130_v39 = vpop.f32.mrf.mxu0 }
  0xdf   :  { %v131_v40 = vadd.f32 %v339_v38, %v130_v39 }
  0xe0   :  { %v402_v41 = vpop.f32.mrf.mxu0 }
  0xe1   :  { %v134_v42 = vmax.f32 %v131_v40, 0.0 }
  0xe3   :  { %436 = vmatmul.mubr.f32.vlgmr.msra.gmra.mxu1 %v134_v42 }
 0x1a3   :  { %v224_v47 = vpop.f32.mrf.mxu1 }
 0x1a4   :  { %v225_v48 = vadd.f32 %v342_v46, %v224_v47 }
 0x1a5   :  { %v437_v49 = vpop.f32.mrf.mxu1 }
 0x1a6   :  { %v228_v50 = vmax.f32 %v225_v48, 0.0 }
 0x1a8   :  { %471 = vmatmul.mubr.f32.vlgmr.msra.gmra.mxu0 %v228_v50 }
 0x268   :  { %v318_v52 = vpop.f32.mrf.mxu0 }
 0x269   :  { %v319_v53 = vadd.f32 %v343_v51, %v318_v52 }
 0x26a   :  { %v472_v54 = vpop.f32.mrf.mxu0 }
 0x26b   :  { %323 = vst.msk [vmem:[#allocation5] sm:$0xff] %vm322_vm3, %v319_v53 }
 0x26c   :  { %510 = shalt.err (!%p507_p9)
}
 0x26d   :  { %333 = dma.vmem_to_hbm [thread:$0]  %s331_s26, 128, %s735_s7, [#allocation4]  }
 0x26e   :  { %521 = dma.done.wait [#allocation4], 128  }
 0x26f   :  { %522 = vsyncadd [#allocation4], 4294967168 }
 0x270   :  { %337 = vsyncpa [#allocation3], 1 }
 0x271   :  { %338 = vsyncpa [#allocation4], 1 }

</bundles_post_ra>
